<compile_context>
chip_gen: v7x
topology: tpu7x:2x2x1
jax: 0.10.0
libtpu: 0.0.40
codegen_flags: <defaults>
</compile_context>

<pallas_src>
import functools

import jax
import jax.numpy as jnp
import numpy as np
from jax import lax
from jax.experimental import pallas as pl
from jax.experimental.pallas import tpu as pltpu


def _conv_bn_relu_kernel(x_ref, w_ref, shift_ref, o_ref, *, W, KH, KW, pad,
                         mma_dtype):
    """One (batch, cout-tile) block of fused Conv(k,s=1,'same') + BN(eval) + ReLU.

    x_ref:     (1, Cin, HW)          flat NCHW activations (f32), lane dim = HW
    w_ref:     (KH*KW, Cout_t, Cin)  BN-scale-folded per-tap weights (mma dtype)
    shift_ref: (Cout_t, 1)           folded conv-bias/BN shift (f32)
    o_ref:     (1, Cout_t, HW)       lane-dense output block
    """
    _, Cin, HW = x_ref.shape
    x = x_ref[0]                                    # (Cin, HW), f32

    margin = pad * W + pad
    # Zero lane margins cover every row (kh) overflow of the 'same' padding.
    if margin > 0:
        zpad = jnp.zeros((Cin, margin), x.dtype)
        xe = jnp.concatenate([zpad, x, zpad], axis=1)   # (Cin, HW + 2*margin)
    else:
        xe = x
    L = HW + 2 * margin

    # Column-edge validity: only taps with kw != center can wrap a column.
    # For column offset dc = kw - pad the wrapped reads land exactly on source
    # columns [W+dc, W-1] (dc<0) or [0, dc-1] (dc>0), which that tap never
    # reads validly, so zeroing them in a per-kw copy of xe implements the mask
    # for all kh at once (2 selects total for a 3x3 kernel).
    # margin % W == pad, so (i - margin) mod W == (i + W - pad) mod W (>= 0).
    src_col = (lax.broadcasted_iota(jnp.int32, (1, L), 1) + (W - pad)) % W

    xe_kw = []
    for kw in range(KW):
        dc = kw - pad
        if dc == 0:
            xv = xe
        elif dc < 0:
            xv = jnp.where(src_col >= W + dc, 0.0, xe)
        else:
            xv = jnp.where(src_col < dc, 0.0, xe)
        # Cast only the matmul operand to the MXU dtype; masking stays in f32.
        xe_kw.append(xv.astype(mma_dtype))

    # KH*KW shift-and-matmul accumulations in f32 (no im2col operand built).
    acc = None
    for kh in range(KH):
        for kw in range(KW):
            d = (kh - pad) * W + (kw - pad)                     # flat tap offset
            shifted = xe_kw[kw][:, margin + d:margin + d + HW]  # (Cin, HW)
            t = kh * KW + kw
            contrib = jnp.dot(w_ref[t], shifted,
                              preferred_element_type=jnp.float32)
            acc = contrib if acc is None else acc + contrib

    # Fused epilogue: conv-bias/BN shift + ReLU in f32. Dropout2d(0.0) = id.
    y = jnp.maximum(acc + shift_ref[...], 0.0)
    o_ref[0] = y.astype(o_ref.dtype)


def _pick_cout_tile(cout, n_batch, target=256):
    """Largest multiple-of-8 divisor of cout <= target (or cout itself)."""
    if cout <= target:
        tile = cout
    else:
        tile = cout
        for t in range(target - (target % 8), 7, -8):
            if cout % t == 0:
                tile = t
                break
    # v7x megacore: expose >= 2 parallel grid steps even at batch 1 if legal.
    if n_batch * (cout // tile) < 2 and cout >= 16 and (cout // 2) % 8 == 0:
        tile = cout // 2
    return tile


def conv_bn_relu(x_nchw, weight_oihw, conv_bias, gamma, beta,
                 running_mean, running_var, eps=1e-5, *,
                 mma_dtype=jnp.float32, out_dtype=None):
    """Fused Conv2d(kxk, stride=1, 'same' pad, bias) + BN(eval) + ReLU.

    Input/output are PyTorch NCHW.  Only free (contiguous) reshapes happen
    outside the kernel: no pads, no transposes, no activation dtype casts.
    """
    N, Cin, H, W = x_nchw.shape
    Cout, Cin_w, KH, KW = weight_oihw.shape
    assert Cin_w == Cin
    # TODO(synk): only square odd kernels with stride=1 and symmetric 'same'
    # padding (the module defaults: kernel_size=3, stride=1, padding=1) are
    # implemented; other configs would need different margin/mask logic.
    assert KH == KW and KH % 2 == 1
    pad = (KH - 1) // 2
    HW = H * W
    out_dtype = x_nchw.dtype if out_dtype is None else out_dtype

    # Eval-mode BN folded into the conv: scale -> weights, shift -> epilogue.
    scale = gamma / jnp.sqrt(running_var + eps)                      # (Cout,)
    w_folded = weight_oihw * scale[:, None, None, None]              # (Cout,Cin,KH,KW)
    w_taps = jnp.transpose(w_folded, (2, 3, 0, 1)).reshape(
        KH * KW, Cout, Cin).astype(mma_dtype)                        # per-tap (Cout,Cin)
    shift = ((conv_bias - running_mean) * scale + beta).reshape(
        Cout, 1).astype(jnp.float32)

    x_flat = x_nchw.reshape(N, Cin, HW)        # free reshape, NO dtype cast

    cout_t = _pick_cout_tile(Cout, N)
    n_ct = Cout // cout_t

    kernel = functools.partial(_conv_bn_relu_kernel, W=W, KH=KH, KW=KW,
                               pad=pad, mma_dtype=mma_dtype)

    # Scoped-VMEM estimate; raise the limit only when the 32 MiB default is
    # insufficient, with 25% headroom, capped below physical VMEM.
    w_isz = jnp.dtype(mma_dtype).itemsize
    o_isz = jnp.dtype(out_dtype).itemsize
    margin = pad * W + pad
    est = (2 * Cin * HW * 4                          # x block (double-buffered)
           + 2 * KH * KW * cout_t * Cin * w_isz      # weights
           + 2 * cout_t * 4                          # shift
           + 2 * cout_t * HW * o_isz                 # out block (double-buffered)
           + cout_t * HW * 4                         # f32 accumulator
           + 4 * Cin * (HW + 2 * margin) * 4)        # xe variants / shifted temps
    est = int(est * 1.25) + (2 << 20)
    cp_kwargs = dict(dimension_semantics=("parallel", "parallel"))
    if est > (32 << 20):
        cp_kwargs["vmem_limit_bytes"] = int(min(est, 100 << 20))

    out = pl.pallas_call(
        kernel,
        out_shape=jax.ShapeDtypeStruct((N, Cout, HW), out_dtype),
        grid_spec=pltpu.PrefetchScalarGridSpec(
            num_scalar_prefetch=0,
            grid=(N, n_ct),
            in_specs=[
                # x: constant block index along the cout axis -> stays resident.
                pl.BlockSpec((1, Cin, HW), lambda n, c: (n, 0, 0)),
                pl.BlockSpec((KH * KW, cout_t, Cin), lambda n, c: (0, c, 0)),
                pl.BlockSpec((cout_t, 1), lambda n, c: (c, 0)),
            ],
            out_specs=pl.BlockSpec((1, cout_t, HW), lambda n, c: (n, c, 0)),
        ),
        compiler_params=pltpu.CompilerParams(**cp_kwargs),
    )(x_flat, w_taps, shift)

    # (N, Cout, H*W) -> NCHW is a free reshape (channel order already matches).
    return out.reshape(N, Cout, H, W)


def _reference(x_nchw, weight_oihw, conv_bias, gamma, beta,
               running_mean, running_var, eps=1e-5):
    y = lax.conv_general_dilated(
        x_nchw, weight_oihw, window_strides=(1, 1),
        padding=((1, 1), (1, 1)),
        dimension_numbers=("NCHW", "OIHW", "NCHW"))
    y = y + conv_bias[None, :, None, None]
    inv_std = 1.0 / jnp.sqrt(running_var + eps)
    y = (y - running_mean[None, :, None, None]) * (gamma * inv_std)[None, :, None, None] \
        + beta[None, :, None, None]
    return jnp.maximum(y, 0.0)


if __name__ == "__main__":
    key = jax.random.PRNGKey(0)
    k_x, k_w, k_b, k_g, k_be, k_m, k_v = jax.random.split(key, 7)

    N, Cin, H, W = 2, 4, 16, 16
    Cout, KH, KW = 8, 3, 3

    x = jax.random.normal(k_x, (N, Cin, H, W), dtype=jnp.float32)

    # Deterministic parameter init (Conv2d kaiming-uniform-like scale).
    fan_in = Cin * KH * KW
    bound = 1.0 / np.sqrt(fan_in)
    weight = jax.random.uniform(k_w, (Cout, Cin, KH, KW),
                                minval=-bound, maxval=bound, dtype=jnp.float32)
    conv_bias = jax.random.uniform(k_b, (Cout,),
                                   minval=-bound, maxval=bound, dtype=jnp.float32)

    # BatchNorm2d eval-mode parameters / running stats (non-trivial, to
    # exercise the weight/shift folding).
    gamma = jax.random.uniform(k_g, (Cout,), minval=0.5, maxval=1.5,
                               dtype=jnp.float32)
    beta = 0.1 * jax.random.normal(k_be, (Cout,), dtype=jnp.float32)
    running_mean = 0.1 * jax.random.normal(k_m, (Cout,), dtype=jnp.float32)
    running_var = jax.random.uniform(k_v, (Cout,), minval=0.5, maxval=1.5,
                                     dtype=jnp.float32)

    ref = _reference(x, weight, conv_bias, gamma, beta,
                     running_mean, running_var)

    # f32 path: exact conv semantics, tight tolerance.
    out = jax.block_until_ready(
        conv_bn_relu(x, weight, conv_bias, gamma, beta,
                     running_mean, running_var))
    np.testing.assert_allclose(np.asarray(out), np.asarray(ref),
                               rtol=1e-4, atol=1e-4)

    # bf16 MXU-operand path (weights bf16 on host, x cast in-kernel before the
    # dot), f32 accumulation and epilogue; activations never re-written to HBM.
    out_bf16 = jax.block_until_ready(
        conv_bn_relu(x, weight, conv_bias, gamma, beta,
                     running_mean, running_var,
                     mma_dtype=jnp.bfloat16))
    np.testing.assert_allclose(np.asarray(out_bf16), np.asarray(ref),
                               rtol=3e-2, atol=3e-2)

    print("KERNEL_OK")
</pallas_src>

<mosaic_0001>
module attributes {stable_mosaic.version = 11 : i64} {
  func.func @_conv_bn_relu_kernel(%arg0: i32, %arg1: i32, %arg2: memref<1x4x256xf32, #tpu.memory_space<vmem>>, %arg3: memref<9x8x4xf32, #tpu.memory_space<vmem>>, %arg4: memref<8x1xf32, #tpu.memory_space<vmem>>, %arg5: memref<1x8x256xf32, #tpu.memory_space<vmem>>) attributes {dimension_semantics = [#tpu.dimension_semantics<parallel>, #tpu.dimension_semantics<parallel>], iteration_bounds = array<i64: 2, 1>, scalar_prefetch = 0 : i64, scratch_operands = 0 : i64, tpu.core_type = #tpu.core_type<tc>, window_params = [{transform_indices = @transform_0, window_bounds = array<i64: 1, 4, 256>}, {transform_indices = @transform_1, window_bounds = array<i64: 9, 8, 4>}, {transform_indices = @transform_2, window_bounds = array<i64: 8, 1>}, {transform_indices = @transform_3, window_bounds = array<i64: 1, 8, 256>}]} {
    %c0 = arith.constant 0 : index
    %c0_0 = arith.constant 0 : index
    %c0_1 = arith.constant 0 : index
    %0 = vector.load %arg2[%c0, %c0_0, %c0_1] : memref<1x4x256xf32, #tpu.memory_space<vmem>>, vector<1x4x256xf32>
    %1 = vector.shape_cast %0 : vector<1x4x256xf32> to vector<4x256xf32>
    %cst = arith.constant 0.000000e+00 : f32
    %2 = vector.broadcast %cst : f32 to vector<4x17xf32>
    %3 = tpu.concatenate %2, %1, %2 in 1 : vector<4x17xf32>, vector<4x256xf32>, vector<4x17xf32> -> vector<4x290xf32>
    %4 = tpu.iota {dimensions = array<i32: 1>} : vector<1x290xi32>
    %c15_i32 = arith.constant 15 : i32
    %5 = vector.broadcast %c15_i32 : i32 to vector<1x290xi32>
    %6 = arith.addi %4, %5 : vector<1x290xi32>
    %c16_i32 = arith.constant 16 : i32
    %c0_i32 = arith.constant 0 : i32
    %7 = arith.cmpi eq, %c16_i32, %c0_i32 : i32
    %c1_i32 = arith.constant 1 : i32
    %8 = arith.select %7, %c1_i32, %c16_i32 : i32
    %9 = vector.broadcast %8 : i32 to vector<1x290xi32>
    %10 = arith.remsi %6, %9 : vector<1x290xi32>
    %c0_i32_2 = arith.constant 0 : i32
    %11 = vector.broadcast %c0_i32_2 : i32 to vector<1x290xi32>
    %12 = arith.cmpi ne, %10, %11 : vector<1x290xi32>
    %c0_i32_3 = arith.constant 0 : i32
    %13 = vector.broadcast %c0_i32_3 : i32 to vector<1x290xi32>
    %14 = arith.cmpi slt, %10, %13 : vector<1x290xi32>
    %c0_i32_4 = arith.constant 0 : i32
    %15 = arith.cmpi slt, %8, %c0_i32_4 : i32
    %16 = vector.broadcast %15 : i1 to vector<1x290xi1>
    %17 = vector.broadcast %16 : vector<1x290xi1> to vector<1x290xi1>
    %18 = arith.xori %14, %17 : vector<1x290xi1>
    %19 = arith.andi %18, %12 : vector<1x290xi1>
    %20 = vector.broadcast %8 : i32 to vector<1x290xi32>
    %21 = arith.addi %10, %20 : vector<1x290xi32>
    %22 = arith.select %19, %21, %10 : vector<1x290xi1>, vector<1x290xi32>
    %c15_i32_5 = arith.constant 15 : i32
    %23 = vector.broadcast %c15_i32_5 : i32 to vector<1x290xi32>
    %24 = arith.cmpi sge, %22, %23 : vector<1x290xi32>
    %cst_6 = arith.constant 0.000000e+00 : f32
    %25 = vector.shape_cast %24 : vector<1x290xi1> to vector<1x290xi1>
    %26 = vector.broadcast %25 : vector<1x290xi1> to vector<4x290xi1>
    %27 = vector.broadcast %cst_6 : f32 to vector<4x290xf32>
    %28 = arith.select %26, %27, %3 : vector<4x290xi1>, vector<4x290xf32>
    %c1_i32_7 = arith.constant 1 : i32
    %29 = vector.broadcast %c1_i32_7 : i32 to vector<1x290xi32>
    %30 = arith.cmpi slt, %22, %29 : vector<1x290xi32>
    %cst_8 = arith.constant 0.000000e+00 : f32
    %31 = vector.shape_cast %30 : vector<1x290xi1> to vector<1x290xi1>
    %32 = vector.broadcast %31 : vector<1x290xi1> to vector<4x290xi1>
    %33 = vector.broadcast %cst_8 : f32 to vector<4x290xf32>
    %34 = arith.select %32, %33, %3 : vector<4x290xi1>, vector<4x290xf32>
    %35 = vector.extract_strided_slice %28 {offsets = [0, 0], sizes = [4, 256], strides = [1, 1]} : vector<4x290xf32> to vector<4x256xf32>
    %c0_9 = arith.constant 0 : index
    %c0_10 = arith.constant 0 : index
    %c0_11 = arith.constant 0 : index
    %36 = vector.load %arg3[%c0_9, %c0_10, %c0_11] : memref<9x8x4xf32, #tpu.memory_space<vmem>>, vector<1x8x4xf32>
    %37 = vector.shape_cast %36 : vector<1x8x4xf32> to vector<8x4xf32>
    %cst_12 = arith.constant dense<0.000000e+00> : vector<8x256xf32>
    %38 = tpu.matmul %37, %35, %cst_12 {dimension_numbers = #tpu.dot_dimension_numbers<[1], [0], [0], [1], [0, 0, 1, 1], [], []>} : vector<8x4xf32>, vector<4x256xf32>, vector<8x256xf32> -> vector<8x256xf32>
    %39 = vector.extract_strided_slice %3 {offsets = [0, 1], sizes = [4, 256], strides = [1, 1]} : vector<4x290xf32> to vector<4x256xf32>
    %c1 = arith.constant 1 : index
    %c0_13 = arith.constant 0 : index
    %c0_14 = arith.constant 0 : index
    %40 = vector.load %arg3[%c1, %c0_13, %c0_14] : memref<9x8x4xf32, #tpu.memory_space<vmem>>, vector<1x8x4xf32>
    %41 = vector.shape_cast %40 : vector<1x8x4xf32> to vector<8x4xf32>
    %cst_15 = arith.constant dense<0.000000e+00> : vector<8x256xf32>
    %42 = tpu.matmul %41, %39, %cst_15 {dimension_numbers = #tpu.dot_dimension_numbers<[1], [0], [0], [1], [0, 0, 1, 1], [], []>} : vector<8x4xf32>, vector<4x256xf32>, vector<8x256xf32> -> vector<8x256xf32>
    %43 = arith.addf %38, %42 : vector<8x256xf32>
    %44 = vector.extract_strided_slice %34 {offsets = [0, 2], sizes = [4, 256], strides = [1, 1]} : vector<4x290xf32> to vector<4x256xf32>
    %c2 = arith.constant 2 : index
    %c0_16 = arith.constant 0 : index
    %c0_17 = arith.constant 0 : index
    %45 = vector.load %arg3[%c2, %c0_16, %c0_17] : memref<9x8x4xf32, #tpu.memory_space<vmem>>, vector<1x8x4xf32>
    %46 = vector.shape_cast %45 : vector<1x8x4xf32> to vector<8x4xf32>
    %cst_18 = arith.constant dense<0.000000e+00> : vector<8x256xf32>
    %47 = tpu.matmul %46, %44, %cst_18 {dimension_numbers = #tpu.dot_dimension_numbers<[1], [0], [0], [1], [0, 0, 1, 1], [], []>} : vector<8x4xf32>, vector<4x256xf32>, vector<8x256xf32> -> vector<8x256xf32>
    %48 = arith.addf %43, %47 : vector<8x256xf32>
    %49 = vector.extract_strided_slice %28 {offsets = [0, 16], sizes = [4, 256], strides = [1, 1]} : vector<4x290xf32> to vector<4x256xf32>
    %c3 = arith.constant 3 : index
    %c0_19 = arith.constant 0 : index
    %c0_20 = arith.constant 0 : index
    %50 = vector.load %arg3[%c3, %c0_19, %c0_20] : memref<9x8x4xf32, #tpu.memory_space<vmem>>, vector<1x8x4xf32>
    %51 = vector.shape_cast %50 : vector<1x8x4xf32> to vector<8x4xf32>
    %cst_21 = arith.constant dense<0.000000e+00> : vector<8x256xf32>
    %52 = tpu.matmul %51, %49, %cst_21 {dimension_numbers = #tpu.dot_dimension_numbers<[1], [0], [0], [1], [0, 0, 1, 1], [], []>} : vector<8x4xf32>, vector<4x256xf32>, vector<8x256xf32> -> vector<8x256xf32>
    %53 = arith.addf %48, %52 : vector<8x256xf32>
    %54 = vector.extract_strided_slice %3 {offsets = [0, 17], sizes = [4, 256], strides = [1, 1]} : vector<4x290xf32> to vector<4x256xf32>
    %c4 = arith.constant 4 : index
    %c0_22 = arith.constant 0 : index
    %c0_23 = arith.constant 0 : index
    %55 = vector.load %arg3[%c4, %c0_22, %c0_23] : memref<9x8x4xf32, #tpu.memory_space<vmem>>, vector<1x8x4xf32>
    %56 = vector.shape_cast %55 : vector<1x8x4xf32> to vector<8x4xf32>
    %cst_24 = arith.constant dense<0.000000e+00> : vector<8x256xf32>
    %57 = tpu.matmul %56, %54, %cst_24 {dimension_numbers = #tpu.dot_dimension_numbers<[1], [0], [0], [1], [0, 0, 1, 1], [], []>} : vector<8x4xf32>, vector<4x256xf32>, vector<8x256xf32> -> vector<8x256xf32>
    %58 = arith.addf %53, %57 : vector<8x256xf32>
    %59 = vector.extract_strided_slice %34 {offsets = [0, 18], sizes = [4, 256], strides = [1, 1]} : vector<4x290xf32> to vector<4x256xf32>
    %c5 = arith.constant 5 : index
    %c0_25 = arith.constant 0 : index
    %c0_26 = arith.constant 0 : index
    %60 = vector.load %arg3[%c5, %c0_25, %c0_26] : memref<9x8x4xf32, #tpu.memory_space<vmem>>, vector<1x8x4xf32>
    %61 = vector.shape_cast %60 : vector<1x8x4xf32> to vector<8x4xf32>
    %cst_27 = arith.constant dense<0.000000e+00> : vector<8x256xf32>
    %62 = tpu.matmul %61, %59, %cst_27 {dimension_numbers = #tpu.dot_dimension_numbers<[1], [0], [0], [1], [0, 0, 1, 1], [], []>} : vector<8x4xf32>, vector<4x256xf32>, vector<8x256xf32> -> vector<8x256xf32>
    %63 = arith.addf %58, %62 : vector<8x256xf32>
    %64 = vector.extract_strided_slice %28 {offsets = [0, 32], sizes = [4, 256], strides = [1, 1]} : vector<4x290xf32> to vector<4x256xf32>
    %c6 = arith.constant 6 : index
    %c0_28 = arith.constant 0 : index
    %c0_29 = arith.constant 0 : index
    %65 = vector.load %arg3[%c6, %c0_28, %c0_29] : memref<9x8x4xf32, #tpu.memory_space<vmem>>, vector<1x8x4xf32>
    %66 = vector.shape_cast %65 : vector<1x8x4xf32> to vector<8x4xf32>
    %cst_30 = arith.constant dense<0.000000e+00> : vector<8x256xf32>
    %67 = tpu.matmul %66, %64, %cst_30 {dimension_numbers = #tpu.dot_dimension_numbers<[1], [0], [0], [1], [0, 0, 1, 1], [], []>} : vector<8x4xf32>, vector<4x256xf32>, vector<8x256xf32> -> vector<8x256xf32>
    %68 = arith.addf %63, %67 : vector<8x256xf32>
    %69 = vector.extract_strided_slice %3 {offsets = [0, 33], sizes = [4, 256], strides = [1, 1]} : vector<4x290xf32> to vector<4x256xf32>
    %c7 = arith.constant 7 : index
    %c0_31 = arith.constant 0 : index
    %c0_32 = arith.constant 0 : index
    %70 = vector.load %arg3[%c7, %c0_31, %c0_32] : memref<9x8x4xf32, #tpu.memory_space<vmem>>, vector<1x8x4xf32>
    %71 = vector.shape_cast %70 : vector<1x8x4xf32> to vector<8x4xf32>
    %cst_33 = arith.constant dense<0.000000e+00> : vector<8x256xf32>
    %72 = tpu.matmul %71, %69, %cst_33 {dimension_numbers = #tpu.dot_dimension_numbers<[1], [0], [0], [1], [0, 0, 1, 1], [], []>} : vector<8x4xf32>, vector<4x256xf32>, vector<8x256xf32> -> vector<8x256xf32>
    %73 = arith.addf %68, %72 : vector<8x256xf32>
    %74 = vector.extract_strided_slice %34 {offsets = [0, 34], sizes = [4, 256], strides = [1, 1]} : vector<4x290xf32> to vector<4x256xf32>
    %c8 = arith.constant 8 : index
    %c0_34 = arith.constant 0 : index
    %c0_35 = arith.constant 0 : index
    %75 = vector.load %arg3[%c8, %c0_34, %c0_35] : memref<9x8x4xf32, #tpu.memory_space<vmem>>, vector<1x8x4xf32>
    %76 = vector.shape_cast %75 : vector<1x8x4xf32> to vector<8x4xf32>
    %cst_36 = arith.constant dense<0.000000e+00> : vector<8x256xf32>
    %77 = tpu.matmul %76, %74, %cst_36 {dimension_numbers = #tpu.dot_dimension_numbers<[1], [0], [0], [1], [0, 0, 1, 1], [], []>} : vector<8x4xf32>, vector<4x256xf32>, vector<8x256xf32> -> vector<8x256xf32>
    %78 = arith.addf %73, %77 : vector<8x256xf32>
    %c0_37 = arith.constant 0 : index
    %c0_38 = arith.constant 0 : index
    %79 = vector.load %arg4[%c0_37, %c0_38] : memref<8x1xf32, #tpu.memory_space<vmem>>, vector<8x1xf32>
    %80 = vector.broadcast %79 : vector<8x1xf32> to vector<8x256xf32>
    %81 = arith.addf %78, %80 : vector<8x256xf32>
    %cst_39 = arith.constant 0.000000e+00 : f32
    %82 = vector.broadcast %cst_39 : f32 to vector<8x256xf32>
    %83 = arith.maximumf %81, %82 : vector<8x256xf32>
    %c0_40 = arith.constant 0 : index
    %c0_41 = arith.constant 0 : index
    %c0_42 = arith.constant 0 : index
    %84 = vector.load %arg5[%c0_40, %c0_41, %c0_42] : memref<1x8x256xf32, #tpu.memory_space<vmem>>, vector<1x8x256xf32>
    %85 = vector.shape_cast %84 : vector<1x8x256xf32> to vector<8x256xf32>
    %86 = vector.shape_cast %83 : vector<8x256xf32> to vector<1x8x256xf32>
    tpu.vector_store %arg5[%c0_40, %c0_41, %c0_42], %86 {strides = array<i32>} : memref<1x8x256xf32, #tpu.memory_space<vmem>>, vector<1x8x256xf32>,
    return
  }
  func.func @transform_0(%arg0: i32, %arg1: i32) -> (i32, i32, i32) {
    %c0_i32 = arith.constant 0 : i32
    %c0_i32_0 = arith.constant 0 : i32
    %c0_i32_1 = arith.constant 0 : i32
    return %arg0, %c0_i32, %c0_i32_0 : i32, i32, i32
  }
  func.func @transform_1(%arg0: i32, %arg1: i32) -> (i32, i32, i32) {
    %c0_i32 = arith.constant 0 : i32
    %c0_i32_0 = arith.constant 0 : i32
    %c0_i32_1 = arith.constant 0 : i32
    return %c0_i32, %arg1, %c0_i32_0 : i32, i32, i32
  }
  func.func @transform_2(%arg0: i32, %arg1: i32) -> (i32, i32) {
    %c0_i32 = arith.constant 0 : i32
    %c0_i32_0 = arith.constant 0 : i32
    return %arg1, %c0_i32 : i32, i32
  }
  func.func @transform_3(%arg0: i32, %arg1: i32) -> (i32, i32, i32) {
    %c0_i32 = arith.constant 0 : i32
    %c0_i32_0 = arith.constant 0 : i32
    return %arg0, %arg1, %c0_i32 : i32, i32, i32
  }
}

</mosaic_0001>

<bundles_post_ra>
// kernel: tpu_custom_call.1
= control target key start
LH: loop header
LB: loop body
LE: loop exit
PB: predicated region body
PF: predicated region fallthrough
CT: control target
= control target key end

     0   :  { %8 = vsyncpa [#allocation3], 0  ;;  %s1682_s0 = inlined_call_operand.vmem [shape: f32[2,4,256], index: 0, kind: input, shape index: {}]   ;;  %s1683_s1 = inlined_call_operand.vmem [shape: f32[9,8,4], index: 1, kind: input, shape index: {}]   ;;  %s1684_s2 = inlined_call_operand.vmem [shape: f32[8,1], index: 2, kind: input, shape index: {}]   ;;  %s1685_s3 = inlined_call_operand.hbm [shape: f32[2,8,256], index: 3, kind: output, shape index: {}]  }
   0x1   :  { %10 = vsyncpa [#allocation3 + $0x1], 0  ;;  %s1490_s12 = smov 0   ;;  %s1492_s13 = smov 0  }
   0x2   :  { %s1494_s14 = smov 0   ;;  %s1496_s15 = smov 0  }
   0x3   :  { %s1498_s16 = smov 0   ;;  %s1500_s17 = smov 0  }
   0x4 LB: > { %s1242_s18 = sadd.s32 4294967295, %s1456_s17   ;;  %s1243_s19 = sadd.s32 4294967294, %s1456_s17   ;;  %s1456_s17 = sphi %s1500_s17, %s16_s17   ;;  %s1452_s16 = sphi %s1498_s16, %s1692_s16   ;;  %s1448_s15 = sphi %s1496_s15, %s1691_s15   ;;  %s1444_s14 = sphi %s1494_s14, %s1690_s14   ;;  %s1440_s13 = sphi %s1492_s13, %s1689_s13   ;;  %s1436_s12 = sphi %s1490_s12, %s1688_s12  }
   0x5   : > { %s28_s20 = sadd.s32 1, %s1452_s16  ;;  %s115_s21 = sadd.s32 1, %s1444_s14 }
   0x6   : > { %p30_p0 = scmp.ge.s32.totalorder %s28_s20, 2  ;;  %p125_p1 = scmp.ne.s32.totalorder %s1444_s14, %s1440_s13 }
   0x7   : > { %p126_p2 = scmp.eq.s32.totalorder %s1242_s18, 1  ;;  %p131_p3 = scmp.ne.s32.totalorder %s1440_s13, %s1436_s12 }
   0x8   : > { %s1694_s20 = smov (%p30_p0, %s28_s20), 0  ;;  %p132_p5 = scmp.eq.s32.totalorder %s1243_s19, 1 }
   0x9   : > { %p1530_p4 = por %p126_p2, %p125_p1  ;;  %s110_s23 = ssub.s32 %s1452_s16, %s1694_s20 }
   0xa   : > { %p1248_p6 = scmp.ge.s32.totalorder %s1456_s17, 1  ;;  %p113_p7 = scmp.eq.s32.totalorder %s110_s23, 0 }
   0xb   : > { %p1537_p8 = por %p132_p5, %p131_p3  ;;  %p172_p9 = scmp.lt.s32.totalorder %s1456_s17, 3 }
   0xc   : > { %s1543_s25 = scalar_select %p113_p7, %s1444_s14, %s115_s21  }
   0xd   : > { %p173_p10 = pnand %p1248_p6, %p172_p9 }
   0xe   : > { %p204_p11 = scmp.lt.s32.totalorder (!%p173_p10), %s1448_s15, 1  ;;  %s1458_s4 = smov (!%p173_p10), 17   ;;  %v231_v2 = vlaneseq (!%p173_p10)  ;;  %vm224_vm0 = vcmask (!%p173_p10), 138240   ;;  %v1461_v12 = vmov (!%p173_p10), 0.0   ;;  %v1468_v24 = vmov (!%p173_p10), 0   ;;  %v1113_v25 = vld [vmem:[%s1684_s2] sm:$0xff] (!%p173_p10) }
   0xf   : > { %176 = sbr.rel (%p173_p10) target bundleno = 541 (0x21d), region = 32  ;;  %s1459_s5 = smov (!%p173_p10), 127   ;;  %740 = vmatprep.mubr.f32.mxu0 (!%p173_p10), %v1461_v12  ;;  %385 = vmatprep.mubr.f32.mxu1 (!%p173_p10), %v1461_v12  ;;  %vm316_vm7 = vcmask (!%p173_p10), 1043456   ;;  %vm666_vm8 = vcmask (!%p173_p10), 908288   ;;  %vm312_vm9 = vcmask (!%p173_p10), 31744   ;;  %v1267_v35 = vld [vmem:[%s1683_s1 + $0x20] sm:$0xff] (!%p173_p10) }
  0x10   : > { %v232_v3 = vand.u32 (!%p173_p10), 127, %v231_v2  ;;  %s1460_s6 = smov (!%p173_p10), 111   ;;  %s1462_s7 = smov (!%p173_p10), 96   ;;  %1376 = vset.pattern.permute.xlu0 (!%p173_p10), %v1468_v24  ;;  %vm309_vm10 = vcmask (!%p173_p10), 1039360   ;;  %v1252_v41 = vld [vmem:[%s1683_s1 + $0x8] sm:$0xff] (!%p173_p10)  ;;  %vm757_vm11 = vcmask (!%p173_p10), 900096  }
  0x11   : > { %s1463_s8 = smov (!%p173_p10), 110   ;;  %s1464_s9 = smov (!%p173_p10), 95   ;;  %v1271_v46 = vld [vmem:[%s1683_s1 + $0x28] sm:$0xff] (!%p173_p10)  ;;  %v298_v49 = vld [vmem:[%s1683_s1] sm:$0xff] (!%p173_p10)  ;;  %vm848_vm12 = vcmask (!%p173_p10), 785408   ;;  %vm939_vm13 = vcmask (!%p173_p10), 777216  }
  0x12   : > { %v235_v4 = vadd.s32 (!%p173_p10), 15, %v232_v3  ;;  %v234_v6 = vadd.s32 (!%p173_p10), 256, %v232_v3  ;;  %v233_v15 = vadd.s32 (!%p173_p10), 128, %v232_v3  ;;  %s1465_s10 = smov (!%p173_p10), 126   ;;  %s1466_s11 = smov (!%p173_p10), 112   ;;  %v1275_v54 = vld [vmem:[%s1683_s1 + $0x30] sm:$0xff] (!%p173_p10) }
  0x13   : > { %s1467_s18 = smov (!%p173_p10), 94   ;;  %vm483_vm14 = vcmask (!%p173_p10), 1031168   ;;  %v1259_v62 = vld [vmem:[%s1683_s1 + $0x10] sm:$0xff] (!%p173_p10)  ;;  %v1279_v63 = vld [vmem:[%s1683_s1 + $0x38] sm:$0xff] (!%p173_p10)  ;;  %vm575_vm15 = vcmask (!%p173_p10), 916480   ;;  %s1293_s28 = sshll.u32 (!%p173_p10), %s1448_s15, 8 }
  0x14   : > { %v242_v5 = vand.u32 (!%p173_p10), 15, %v235_v4  ;;  %v237_v9 = vadd.s32 (!%p173_p10), 15, %v234_v6  ;;  %v236_v18 = vadd.s32 (!%p173_p10), 15, %v233_v15 }
  0x16   : > { %s205_s26 = scalar_select %p204_p11, %s1448_s15, 1  ;;  %vm274_vm1 = vcmp.ge.s32.totalorder %v242_v5, 15  ;;  %vm286_vm2 = vcmp.lt.s32.totalorder %v242_v5, 1  ;;  %v256_v14 = vand.u32 15, %v237_v9  ;;  %v249_v20 = vand.u32 15, %v236_v18  ;;  %v1283_v9 = vld [vmem:[%s1683_s1 + $0x40] sm:$0xff] }
  0x17   : > { %s1469_s15 = smov [#allocation2]  }
  0x18   : > { %s1292_s27 = sshll.u32 %s205_s26, 3  ;;  %vm288_vm3 = vcmp.lt.s32.totalorder %v256_v14, 1  ;;  %vm276_vm4 = vcmp.ge.s32.totalorder %v256_v14, 15  ;;  %vm287_vm5 = vcmp.lt.s32.totalorder %v249_v20, 1  ;;  %vm275_vm6 = vcmp.ge.s32.totalorder %v249_v20, 15  ;;  %s201_s26 = sand.u32 1, %s1440_s13  }
  0x19   : > { %s208_s30 = scalar_lea.vmem %s1682_s0, %s1292_s27  ;;  %s1249_s27 = sshll.u32 %s201_s26, 4 }
  0x1a   : > { %v217_v0 = vld [vmem:[%s208_s30] sm:$0xff]  ;;  %s203_s29 = scalar_lea.vmem [#allocation2], %s1249_s27 }
  0x1b   : > { %220 = vrot.lane.b32.xlu0 %v217_v0, %s1458_s4  ;;  %v219_v1 = vcombine.high %v217_v0, %v217_v0  ;;  %s1142_s30 = sshll.u32 %s203_s29, 4  ;;  %s1637_s30 = int_to_ptr.vmem [resolvable:$true] %s1142_s30 }
  0x1f   : > { %222 = vrot.lane.b32.xlu0 %v219_v1, %s1458_s4 }
  0x8d   : > { %v221_v7 = vpop.permute.xlu0 %220 }
  0x8e   : > { %v229_v8 = vsel %vm224_vm0, 0.0, %v221_v7 }
  0x8f   : > { %303 = vrot.lane.b32.xlu1 %v229_v8, %s1459_s5  ;;  %660 = vrot.lane.b32.xlu0 %v229_v8, %s1460_s6  ;;  %v1552_v10 = vsel %vm274_vm1, 0.0, %v229_v8  ;;  %v295_v11 = vsel %vm286_vm2, 0.0, %v229_v8 }
  0x91   : > { %v223_v13 = vpop.permute.xlu0 %222 }
  0x92   : > { %v230_v16 = vsel %vm224_vm0, %v223_v13, 0.0  ;;  %v225_v17 = vsel %vm224_vm0, %v221_v7, %v223_v13  ;;  %vm1030_vm0 = vcmask 769024   ;;  %v1263_v7 = vld [vmem:[%s1683_s1 + $0x18] sm:$0xff] }
  0x93   : > { %842 = vrot.lane.b32.xlu1 %v1552_v10, %s1462_s7  ;;  %751 = vrot.lane.b32.xlu0 %v295_v11, %s1463_s8  ;;  %v297_v19 = vsel %vm288_vm3, 0.0, %v230_v16  ;;  %v285_v21 = vsel %vm276_vm4, 0.0, %v230_v16  ;;  %v296_v22 = vsel %vm287_vm5, 0.0, %v225_v17  ;;  %v284_v23 = vsel %vm275_vm6, 0.0, %v225_v17 }
  0x97   : > { %307 = vrot.lane.b32.xlu0 %v230_v16, %s1459_s5  ;;  %662 = vrot.lane.b32.xlu1 %v225_v17, %s1460_s6 }
  0x9b   : > { %755 = vrot.lane.b32.xlu0 %v297_v19, %s1463_s8  ;;  %664 = vrot.lane.b32.xlu1 %v230_v16, %s1460_s6  ;;  %s1635_s6 = scalar_lea.hbm %s1685_s3, %s1293_s28 }
  0x9f   : > { %935 = vrot.lane.b32.xlu0 %v225_v17, %s1464_s9  ;;  %305 = vrot.lane.b32.xlu1 %v225_v17, %s1459_s5 }
  0xa3   : > { %846 = vrot.lane.b32.xlu0 %v285_v21, %s1462_s7  ;;  %753 = vrot.lane.b32.xlu1 %v296_v22, %s1463_s8  ;;  %s1378_s8 = scalar_lea.vmem %s1637_s30, 256 }
  0xa4   : > { %p1379_p12 = scmp.ne.s32.totalorder %s1637_s30, %s1378_s8 }
  0xa6   : > { %p1380_p13 = pnand %p1379_p12, %p1530_p4 }
  0xa7   : > { %477 = vrot.lane.b32.xlu0 %v295_v11, %s1465_s10  ;;  %937 = vrot.lane.b32.xlu1 %v230_v16, %s1464_s9 }
  0xa8   : > { %p1381_p0 = pneg %p1380_p13 }
  0xab   : > { %479 = vrot.lane.b32.xlu0 %v296_v22, %s1465_s10  ;;  %844 = vrot.lane.b32.xlu1 %v284_v23, %s1462_s7  ;;  %s1126_s7 = scalar_lea.sflag [#allocation3], %s201_s26 }
  0xaf   : > { %571 = vrot.lane.b32.xlu0 %v284_v23, %s1466_s11  ;;  %933 = vrot.lane.b32.xlu1 %v229_v8, %s1464_s9  ;;  %s1382_s9 = sshll.u32 %s1469_s15, 4  ;;  %s1383_s9 = int_to_ptr.vmem [resolvable:$false] %s1382_s9 }
  0xb0   : > { %p1385_p1 = scmp.lt.s32.totalorder %s1637_s30, %s1383_s9 }
  0xb3   : > { %1026 = vrot.lane.b32.xlu0 %v296_v22, %s1467_s18  ;;  %481 = vrot.lane.b32.xlu1 %v297_v19, %s1465_s10  ;;  %s1384_s10 = scalar_lea.vmem %s1383_s9, 512 }
  0xb4   : > { %p1386_p2 = scmp.lt.s32.totalorder %s1384_s10, %s1378_s8 }
  0xb6   : > { %p1387_p3 = por %p1386_p2, %p1385_p1 }
  0xb7   : > { %569 = vrot.lane.b32.xlu0 %v1552_v10, %s1466_s11  ;;  %573 = vrot.lane.b32.xlu1 %v285_v21, %s1466_s11 }
  0xb8   : > { %p1388_p5 = pnand %p1387_p3, %p1381_p0 }
  0xbb   : > { %1028 = vrot.lane.b32.xlu1 %v297_v19, %s1467_s18  ;;  %1116 = vperm.xlu0 %1376, %v1113_v25  }
  0xbf   : > { %1024 = vrot.lane.b32.xlu1 %v295_v11, %s1467_s18 }
 0x101   : > { %v304_v26 = vpop.permute.xlu1 %303  ;;  %v661_v27 = vpop.permute.xlu0 %660 }
 0x105   : > { %v843_v28 = vpop.permute.xlu1 %842  ;;  %v752_v29 = vpop.permute.xlu0 %751 }
 0x109   : > { %v663_v30 = vpop.permute.xlu1 %662  ;;  %v308_v31 = vpop.permute.xlu0 %307 }
 0x10a   : > { %v667_v36 = vsel %vm666_vm8, %v661_v27, %v663_v30 }
 0x10d   : > { %v665_v32 = vpop.permute.xlu1 %664  ;;  %v756_v33 = vpop.permute.xlu0 %755 }
 0x10e   : > { %v668_v34 = vsel %vm666_vm8, %v663_v30, %v665_v32 }
 0x10f   : > { %1268 = vmatprep.subr.msk.mxu0 %vm316_vm7, %v668_v34 }
 0x110   : > { %1269 = vmatpush1.msk.msra.mxu0 %vm316_vm7, %v667_v36 }
 0x111   : > { %v306_v37 = vpop.permute.xlu1 %305  ;;  %v936_v38 = vpop.permute.xlu0 %935  ;;  %1270 = vmatmul.mubr.msk.f32.vlgmr.msra.gmra.mrb[0].mxu0 %vm312_vm9, %v1267_v35 }
 0x112   : > { %v311_v39 = vsel %vm309_vm10, %v306_v37, %v308_v31  ;;  %v310_v40 = vsel %vm309_vm10, %v304_v26, %v306_v37  ;;  %831 = vmatprep.mubr.f32.mxu0 %v1461_v12 }
 0x113   : > { %1253 = vmatprep.subr.msk.mxu1 %vm316_vm7, %v311_v39 }
 0x114   : > { %1254 = vmatpush1.msk.msra.mxu1 %vm316_vm7, %v310_v40 }
 0x115   : > { %v754_v42 = vpop.permute.xlu1 %753  ;;  %1256 = vmatprep.subr.msk.mxu1 %vm316_vm7, %v284_v23  ;;  %v847_v43 = vpop.permute.xlu0 %846  ;;  %1255 = vmatmul.mubr.msk.f32.vlgmr.msra.gmra.mrb[0].mxu1 %vm312_vm9, %v1252_v41 }
 0x116   : > { %v758_v44 = vsel %vm757_vm11, %v752_v29, %v754_v42  ;;  %v759_v45 = vsel %vm757_vm11, %v754_v42, %v756_v33  ;;  %1257 = vmatpush1.msk.msra.mxu1 %vm316_vm7, %v1552_v10  ;;  %465 = vmatprep.mubr.f32.mxu1 %v1461_v12 }
 0x117   : > { %1272 = vmatprep.subr.msk.mxu0 %vm316_vm7, %v759_v45 }
 0x118   : > { %1273 = vmatpush1.msk.msra.mxu0 %vm316_vm7, %v758_v44 }
 0x119   : > { %v938_v47 = vpop.permute.xlu1 %937  ;;  %v478_v48 = vpop.permute.xlu0 %477  ;;  %1274 = vmatmul.mubr.msk.f32.vlgmr.msra.gmra.mrb[0].mxu0 %vm312_vm9, %v1271_v46 }
 0x11a   : > { %922 = vmatprep.mubr.f32.mxu0 %v1461_v12  ;;  %v941_v55 = vsel %vm939_vm13, %v936_v38, %v938_v47 }
 0x11d   : > { %v845_v50 = vpop.permute.xlu1 %844  ;;  %v480_v51 = vpop.permute.xlu0 %479  ;;  %1258 = vmatmul.mubr.msk.f32.vlgmr.msra.gmra.mrb[0].mxu1 %vm312_vm9, %v298_v49 }
 0x11e   : > { %v849_v52 = vsel %vm848_vm12, %v843_v28, %v845_v50  ;;  %v850_v53 = vsel %vm848_vm12, %v845_v50, %v847_v43  ;;  %557 = vmatprep.mubr.f32.mxu1 %v1461_v12  ;;  %v484_v0 = vsel %vm483_vm14, %v478_v48, %v480_v51 }
 0x11f   : > { %1276 = vmatprep.subr.msk.mxu0 %vm316_vm7, %v850_v53 }
 0x120   : > { %1277 = vmatpush1.msk.msra.mxu0 %vm316_vm7, %v849_v52 }
 0x121   : > { %v934_v56 = vpop.permute.xlu1 %933  ;;  %1280 = vmatprep.subr.msk.mxu0 %vm316_vm7, %v941_v55  ;;  %v572_v57 = vpop.permute.xlu0 %571  ;;  %1278 = vmatmul.mubr.msk.f32.vlgmr.msra.gmra.mrb[0].mxu0 %vm312_vm9, %v1275_v54 }
 0x122   : > { %v940_v58 = vsel %vm939_vm13, %v934_v56, %v936_v38  ;;  %1013 = vmatprep.mubr.f32.mxu0 %v1461_v12 }
 0x123   : > { %1281 = vmatpush1.msk.msra.mxu0 %vm316_vm7, %v940_v58 }
 0x125   : > { %v482_v59 = vpop.permute.xlu1 %481  ;;  %v1027_v60 = vpop.permute.xlu0 %1026 }
 0x126   : > { %v485_v61 = vsel %vm483_vm14, %v480_v51, %v482_v59 }
 0x127   : > { %1260 = vmatprep.subr.msk.mxu1 %vm316_vm7, %v485_v61 }
 0x128   : > { %1261 = vmatpush1.msk.msra.mxu1 %vm316_vm7, %v484_v0 }
 0x129   : > { %v574_v1 = vpop.permute.xlu1 %573  ;;  %1262 = vmatmul.mubr.msk.f32.vlgmr.msra.gmra.mrb[0].mxu1 %vm312_vm9, %v1259_v62  ;;  %v570_v2 = vpop.permute.xlu0 %569  ;;  %1282 = vmatmul.mubr.msk.f32.vlgmr.msra.gmra.mrb[0].mxu0 %vm312_vm9, %v1279_v63 }
 0x12a   : > { %v577_v3 = vsel %vm575_vm15, %v572_v57, %v574_v1  ;;  %v576_v4 = vsel %vm575_vm15, %v570_v2, %v572_v57  ;;  %649 = vmatprep.mubr.f32.mxu1 %v1461_v12  ;;  %1104 = vmatprep.mubr.f32.mxu0 %v1461_v12 }
 0x12b   : > { %1264 = vmatprep.subr.msk.mxu1 %vm316_vm7, %v577_v3 }
 0x12c   : > { %1265 = vmatpush1.msk.msra.mxu1 %vm316_vm7, %v576_v4 }
 0x12d   : > { %v1029_v5 = vpop.permute.xlu1 %1028 }
 0x12e   : > { %v1032_v6 = vsel %vm1030_vm0, %v1027_v60, %v1029_v5 }
 0x12f   : > { %1284 = vmatprep.subr.msk.mxu0 %vm316_vm7, %v1032_v6 }
 0x131   : > { %v1025_v8 = vpop.permute.xlu1 %1024  ;;  %1266 = vmatmul.mubr.msk.f32.vlgmr.msra.gmra.mrb[0].mxu1 %vm312_vm9, %v1263_v7 }
 0x132   : > { %v1031_v10 = vsel %vm1030_vm0, %v1025_v8, %v1027_v60 }
 0x133   : > { %1285 = vmatpush1.msk.msra.mxu0 %vm316_vm7, %v1031_v10 }
 0x134   : > { %1286 = vmatmul.mubr.msk.f32.vlgmr.msra.gmra.mrb[0].mxu0 %vm312_vm9, %v1283_v9 }
 0x13a   : > { %v1117_v14 = vpop.permute.xlu0 %1116 }
 0x204   : > { %v651_v11 = vpop.f32.mrb[0].mxu1 }
 0x205   : > { %v653_v12 = vpop.f32.mrb[1].mxu1 }
 0x207   : > { %v1106_v13 = vpop.f32.mrb[0].mxu0 }
 0x208   : > { %v1294_v15 = vadd.f32 %v1106_v13, %v651_v11  ;;  %v1108_v16 = vpop.f32.mrb[1].mxu0 }
 0x209   : > { %v1295_v17 = vadd.f32 %v1108_v16, %v653_v12 }
 0x20a   : > { %v1119_v18 = vadd.f32 %v1294_v15, %v1117_v14 }
 0x20b   : > { %v1120_v19 = vadd.f32 %v1295_v17, %v1117_v14 }
 0x20c   : > { %v1121_v20 = vmax.f32 %v1119_v18, 0.0 }
 0x20d   : > { %v1122_v21 = vmax.f32 %v1120_v19, 0.0 }
 0x20e   : > { %1123 = vst [vmem:[%s203_s29] sm:$0xff] %v1121_v20 }
 0x20f   : > { %1124 = vst [vmem:[%s203_s29 + $0x8] sm:$0xff] %v1122_v21 }
 0x210   : > { %1391 = shalt.err (!%p1388_p5)
}
 0x211   : > { %s1392_s11 = scalar_lea.hbm %s1635_s6, 256  ;;  %s1396_s21 = scalar_lea.hbm %s1685_s3, 512 }
 0x212   : > { %p1393_p6 = scmp.ne.s32.totalorder %s1635_s6, %s1392_s11  ;;  %p1397_p10 = scmp.lt.u32.totalorder %s1635_s6, %s1685_s3 }
 0x213   : > { %p1398_p11 = scmp.lt.u32.totalorder %s1396_s21, %s1392_s11  ;;  %p1400_p13 = scmp.lt.u32.totalorder %s1392_s11, %s1635_s6 }
 0x214   : > { %p1394_p7 = pnand %p1393_p6, %p1530_p4 }
 0x215   : > { %p1399_p12 = por %p1398_p11, %p1397_p10 }
 0x216   : > { %p1395_p9 = pneg %p1394_p7 }
 0x217   : > { %p1401_p0 = por %p1400_p13, %p1399_p12 }
 0x219   : > { %p1402_p1 = pnand %p1401_p0, %p1395_p9 }
 0x21b   : > { %1405 = shalt.err (!%p1402_p1)
}
 0x21c   : > { %1310 = dma.vmem_to_hbm [thread:$0]  (%p1530_p4), %s1637_s30, 256, %s1635_s6, %s1126_s7  }
 0x21d PF: > { %p1316_p2 = scmp.ge.s32.totalorder %s1456_s17, 2  ;;  %s1154_s27 = sand.u32 1, %s1436_s12  }
 0x21e   : > { %s1155_s28 = scalar_lea.sflag [#allocation3], %s1154_s27 }
 0x21f   : > { %p1313_p3 = pnand %p1316_p2, %p1537_p8 }
 0x221   : > { %1431 = dma.done.wait (!%p1313_p3), %s1155_s28, 256  }
 0x222   : > { %1433 = vsyncadd (!%p1313_p3), %s1155_s28, 4294967040  ;;  %s16_s17 = sadd.s32 1, %s1456_s17   ;;  %s1688_s12 = smov %s1440_s13 }
 0x223   : > { %p13_p5 = scmp.ge.s32.totalorder %s16_s17, 4   ;;  %s1689_s13 = smov %s1444_s14 }
 0x224   : > { %s1690_s14 = smov %s1543_s25  ;;  %s1691_s15 = smov %s1452_s16 }
 0x225   : > { %s1692_s16 = smov %s1694_s20  ;;  %15 = sbr.rel (!%p13_p5) target bundleno = 4 (0x4), region = 81 }
 0x22c   :  { %1160 = vsyncpa [#allocation3], 1 }
 0x22d   :  { %1162 = vsyncpa [#allocation3 + $0x1], 1 }

</bundles_post_ra>
